<compile_context>
chip_gen: v7x
topology: tpu7x:2x2x1
jax: 0.10.0
libtpu: 0.0.40
codegen_flags: <defaults>
</compile_context>

<pallas_src>
import jax
import jax.numpy as jnp
from jax import lax
from jax.experimental import pallas as pl
from jax.experimental.pallas import tpu as pltpu

LANE = 128
SUBLANE = 8


def _round_up(x, m):
    return (x + m - 1) // m * m


# ----------------------------- Pallas kernel -------------------------------

def _sage_layer_compute(adj, x, wl_t, bl, wr_t):
    """One SAGEConv(aggr='mean', normalize=True) + tanh on padded f32 tiles."""
    agg = jnp.dot(adj, x, preferred_element_type=jnp.float32)          # mean aggregation
    z = jnp.dot(agg, wl_t, preferred_element_type=jnp.float32) + bl    # lin_l(agg) + bias
    z = z + jnp.dot(x, wr_t, preferred_element_type=jnp.float32)       # + lin_r(x)
    # F.normalize(z, dim=-1, eps=1e-12); padded lanes are exactly zero so the
    # sum-of-squares only sees real channels.  rsqrt -> EUP slot (idle otherwise).
    sumsq = jnp.sum(z * z, axis=-1, keepdims=True)
    z = z * lax.rsqrt(jnp.maximum(sumsq, 1e-24))
    return jnp.tanh(z)


def make_fused_graphsage_kernel(hop):
    """Fused kernel body: `hop` SAGE layers + classifier + LogSoftmax(dim=1)."""
    def kernel(*refs):
        adj = refs[0][...]                      # (Np, Np) mean-normalized adjacency
        h = refs[1][...]                        # (Np, Fp) node features
        idx = 2
        for _ in range(hop):
            wl_t = refs[idx][...]               # (Kp, Hp)  = W_l^T zero-padded
            bl = refs[idx + 1][...]             # (1, Hp)
            wr_t = refs[idx + 2][...]           # (Kp, Hp)  = W_r^T zero-padded
            idx += 3
            h = _sage_layer_compute(adj, h, wl_t, bl, wr_t)
        wc_t = refs[idx][...]                   # (Hp, Cp)  = W_c^T zero-padded
        bc = refs[idx + 1][...]                 # (1, Cp), padded classes carry -1e30
        out_ref = refs[idx + 2]
        h_ref = refs[idx + 3]
        # classifier + log-softmax.  Padded class lanes have bias -1e30, so their
        # exp() underflows to 0 and they do not perturb the real log-sum-exp.
        logits = jnp.dot(h, wc_t, preferred_element_type=jnp.float32) + bc
        m = jnp.max(logits, axis=-1, keepdims=True)
        lse = m + jnp.log(jnp.sum(jnp.exp(logits - m), axis=-1, keepdims=True))
        out_ref[...] = logits - lse
        h_ref[...] = h
    return kernel


# ----------------------------- wrappers -------------------------------------

def _full_spec(shape):
    # one grid step, whole-array block resident in VMEM
    return pl.BlockSpec(shape, lambda i: tuple(0 for _ in shape))


def _pad2(a, rows, cols):
    r, c = a.shape
    return jnp.pad(a, ((0, rows - r), (0, cols - c)))


def build_mean_adjacency(edge_index, num_nodes):
    """A_mean[dst, src] = 1/in_deg(dst) for each edge (src -> dst); isolated rows stay 0."""
    src, dst = edge_index[0], edge_index[1]
    adj = jnp.zeros((num_nodes, num_nodes), jnp.float32).at[dst, src].add(1.0)
    deg = jnp.sum(adj, axis=1, keepdims=True)
    return adj / jnp.maximum(deg, 1.0)


def graphsage_forward(x, edge_index, params, hop=2, node_out_dim=20):
    if node_out_dim != 20:
        # TODO(synk): node_out_dim==1 sigmoid branch not exercised in this synthetic config.
        raise NotImplementedError()

    n, f_in = x.shape
    hidden = params["convs"][0][0].shape[0]
    n_cls = params["w_c"].shape[0]

    n_p = _round_up(n, SUBLANE)           # sublane-aligned node count
    f_p = _round_up(f_in, LANE)           # lane-dense feature dim
    h_p = _round_up(hidden, LANE)         # lane-dense hidden dim
    c_p = _round_up(n_cls, LANE)          # lane-dense class dim

    adj_p = _pad2(build_mean_adjacency(edge_index, n), n_p, n_p)
    x_p = _pad2(x, n_p, f_p)

    operands = [adj_p, x_p]
    in_specs = [_full_spec((n_p, n_p)), _full_spec((n_p, f_p))]

    k_dim = f_p
    flops = 0
    for layer in range(hop):
        w_l, b_l, w_r = params["convs"][layer]
        wl_t = _pad2(w_l.T, k_dim, h_p)                       # pre-transposed, zero-padded
        wr_t = _pad2(w_r.T, k_dim, h_p)
        bl = _pad2(b_l.reshape(1, -1).astype(jnp.float32), 1, h_p)
        operands += [wl_t, bl, wr_t]
        in_specs += [_full_spec((k_dim, h_p)), _full_spec((1, h_p)),
                     _full_spec((k_dim, h_p))]
        flops += 2 * n_p * n_p * k_dim + 4 * n_p * k_dim * h_p
        k_dim = h_p

    wc_t = _pad2(params["w_c"].T, h_p, c_p)
    bc = jnp.full((1, c_p), -1e30, jnp.float32).at[0, :n_cls].set(params["b_c"])
    operands += [wc_t, bc]
    in_specs += [_full_spec((h_p, c_p)), _full_spec((1, c_p))]
    flops += 2 * n_p * h_p * c_p

    transcendentals = hop * (n_p * h_p + n_p) + n_p * c_p + n_p   # tanh, rsqrt, exp, log
    bytes_accessed = sum(int(op.size) * 4 for op in operands) + 4 * (n_p * c_p + n_p * h_p)

    out_p, h_out_p = pl.pallas_call(
        make_fused_graphsage_kernel(hop),
        out_shape=(jax.ShapeDtypeStruct((n_p, c_p), jnp.float32),
                   jax.ShapeDtypeStruct((n_p, h_p), jnp.float32)),
        grid=(1,),
        in_specs=in_specs,
        out_specs=(_full_spec((n_p, c_p)), _full_spec((n_p, h_p))),
        compiler_params=pltpu.CompilerParams(
            dimension_semantics=("arbitrary",)),
        cost_estimate=pl.CostEstimate(
            flops=flops,
            transcendentals=transcendentals,
            bytes_accessed=bytes_accessed),
    )(*operands)

    return out_p[:n, :n_cls], h_out_p[:n, :hidden]


# ----------------------------- pure-JAX reference ----------------------------

def reference_forward(x, edge_index, params, hop=2):
    adj = build_mean_adjacency(edge_index, x.shape[0])
    h = x
    for (w_l, b_l, w_r) in params["convs"]:
        agg = adj @ h
        z = agg @ w_l.T + b_l + h @ w_r.T
        z = z / jnp.maximum(jnp.linalg.norm(z, axis=-1, keepdims=True), 1e-12)
        h = jnp.tanh(z)
    logits = h @ params["w_c"].T + params["b_c"]
    return jax.nn.log_softmax(logits, axis=-1), h


# ----------------------------- parameter init -------------------------------

def init_params(key, node_attr_dim, hidden_dim, node_out_dim, hop):
    convs = []
    in_dim = node_attr_dim
    for _ in range(hop):
        key, k1, k2, k3 = jax.random.split(key, 4)
        scale = 1.0 / jnp.sqrt(in_dim)
        w_l = jax.random.uniform(k1, (hidden_dim, in_dim), jnp.float32, -scale, scale)
        b_l = jax.random.uniform(k2, (hidden_dim,), jnp.float32, -scale, scale)
        w_r = jax.random.uniform(k3, (hidden_dim, in_dim), jnp.float32, -scale, scale)
        convs.append((w_l, b_l, w_r))
        in_dim = hidden_dim
    key, k1, k2 = jax.random.split(key, 3)
    scale = 1.0 / jnp.sqrt(hidden_dim)
    w_c = jax.random.uniform(k1, (node_out_dim, hidden_dim), jnp.float32, -scale, scale)
    b_c = jax.random.uniform(k2, (node_out_dim,), jnp.float32, -scale, scale)
    return {"convs": convs, "w_c": w_c, "b_c": b_c}


# ----------------------------- main -----------------------------------------

if __name__ == "__main__":
    NODE_ATTR_DIM = 8
    HIDDEN_DIM = 32
    NODE_OUT_DIM = 20
    HOP = 2
    N_NODES = 16

    key = jax.random.PRNGKey(0)
    key, kx = jax.random.split(key)
    x = jax.random.normal(kx, (N_NODES, NODE_ATTR_DIM), jnp.float32)

    # deterministic ring graph (both directions) -> every node has in-degree 2
    src = jnp.concatenate([jnp.arange(N_NODES), jnp.arange(N_NODES)])
    dst = jnp.concatenate([(jnp.arange(N_NODES) + 1) % N_NODES,
                           (jnp.arange(N_NODES) - 1) % N_NODES])
    edge_index = jnp.stack([src, dst]).astype(jnp.int32)   # shape (2, 2N)

    params = init_params(key, NODE_ATTR_DIM, HIDDEN_DIM, NODE_OUT_DIM, HOP)

    out, h = graphsage_forward(x, edge_index, params, hop=HOP,
                               node_out_dim=NODE_OUT_DIM)
    jax.block_until_ready(out)
    jax.block_until_ready(h)

    assert out.shape == (N_NODES, NODE_OUT_DIM)
    assert h.shape == (N_NODES, HIDDEN_DIM)
    # log-softmax rows should sum (in prob space) to ~1
    assert jnp.allclose(jnp.sum(jnp.exp(out), axis=1), 1.0, atol=1e-4)

    # check against a pure-JAX reference of the same forward
    out_ref, h_ref = reference_forward(x, edge_index, params, hop=HOP)
    assert jnp.allclose(out, out_ref, atol=1e-4, rtol=1e-4)
    assert jnp.allclose(h, h_ref, atol=1e-4, rtol=1e-4)

    print("KERNEL_OK")
</pallas_src>

<mosaic_0001>
module attributes {stable_mosaic.version = 11 : i64} {
  func.func @kernel(%arg0: i32, %arg1: memref<16x16xf32, #tpu.memory_space<vmem>>, %arg2: memref<16x128xf32, #tpu.memory_space<vmem>>, %arg3: memref<128x128xf32, #tpu.memory_space<vmem>>, %arg4: memref<1x128xf32, #tpu.memory_space<vmem>>, %arg5: memref<128x128xf32, #tpu.memory_space<vmem>>, %arg6: memref<128x128xf32, #tpu.memory_space<vmem>>, %arg7: memref<1x128xf32, #tpu.memory_space<vmem>>, %arg8: memref<128x128xf32, #tpu.memory_space<vmem>>, %arg9: memref<128x128xf32, #tpu.memory_space<vmem>>, %arg10: memref<1x128xf32, #tpu.memory_space<vmem>>, %arg11: memref<16x128xf32, #tpu.memory_space<vmem>>, %arg12: memref<16x128xf32, #tpu.memory_space<vmem>>) attributes {dimension_semantics = [#tpu.dimension_semantics<arbitrary>], iteration_bounds = array<i64: 1>, scalar_prefetch = 0 : i64, scratch_operands = 0 : i64, tpu.core_type = #tpu.core_type<tc>, window_params = [{pipeline_mode = #tpu.pipeline_mode<synchronous>, transform_indices = @transform_0, window_bounds = array<i64: 16, 16>}, {pipeline_mode = #tpu.pipeline_mode<synchronous>, transform_indices = @transform_1, window_bounds = array<i64: 16, 128>}, {pipeline_mode = #tpu.pipeline_mode<synchronous>, transform_indices = @transform_2, window_bounds = array<i64: 128, 128>}, {pipeline_mode = #tpu.pipeline_mode<synchronous>, transform_indices = @transform_3, window_bounds = array<i64: 1, 128>}, {pipeline_mode = #tpu.pipeline_mode<synchronous>, transform_indices = @transform_4, window_bounds = array<i64: 128, 128>}, {pipeline_mode = #tpu.pipeline_mode<synchronous>, transform_indices = @transform_5, window_bounds = array<i64: 128, 128>}, {pipeline_mode = #tpu.pipeline_mode<synchronous>, transform_indices = @transform_6, window_bounds = array<i64: 1, 128>}, {pipeline_mode = #tpu.pipeline_mode<synchronous>, transform_indices = @transform_7, window_bounds = array<i64: 128, 128>}, {pipeline_mode = #tpu.pipeline_mode<synchronous>, transform_indices = @transform_8, window_bounds = array<i64: 128, 128>}, {pipeline_mode = #tpu.pipeline_mode<synchronous>, transform_indices = @transform_9, window_bounds = array<i64: 1, 128>}, {pipeline_mode = #tpu.pipeline_mode<synchronous>, transform_indices = @transform_10, window_bounds = array<i64: 16, 128>}, {pipeline_mode = #tpu.pipeline_mode<synchronous>, transform_indices = @transform_11, window_bounds = array<i64: 16, 128>}]} {
    %c0 = arith.constant 0 : index
    %c0_0 = arith.constant 0 : index
    %0 = vector.load %arg1[%c0, %c0_0] : memref<16x16xf32, #tpu.memory_space<vmem>>, vector<16x16xf32>
    %c0_1 = arith.constant 0 : index
    %c0_2 = arith.constant 0 : index
    %1 = vector.load %arg2[%c0_1, %c0_2] : memref<16x128xf32, #tpu.memory_space<vmem>>, vector<16x128xf32>
    %c0_3 = arith.constant 0 : index
    %c0_4 = arith.constant 0 : index
    %2 = vector.load %arg3[%c0_3, %c0_4] : memref<128x128xf32, #tpu.memory_space<vmem>>, vector<128x128xf32>
    %c0_5 = arith.constant 0 : index
    %c0_6 = arith.constant 0 : index
    %3 = vector.load %arg4[%c0_5, %c0_6] : memref<1x128xf32, #tpu.memory_space<vmem>>, vector<1x128xf32>
    %c0_7 = arith.constant 0 : index
    %c0_8 = arith.constant 0 : index
    %4 = vector.load %arg5[%c0_7, %c0_8] : memref<128x128xf32, #tpu.memory_space<vmem>>, vector<128x128xf32>
    %cst = arith.constant dense<0.000000e+00> : vector<16x128xf32>
    %5 = tpu.matmul %0, %1, %cst {dimension_numbers = #tpu.dot_dimension_numbers<[1], [0], [0], [1], [0, 0, 1, 1], [], []>} : vector<16x16xf32>, vector<16x128xf32>, vector<16x128xf32> -> vector<16x128xf32>
    %cst_9 = arith.constant dense<0.000000e+00> : vector<16x128xf32>
    %6 = tpu.matmul %5, %2, %cst_9 {dimension_numbers = #tpu.dot_dimension_numbers<[1], [0], [0], [1], [0, 0, 1, 1], [], []>} : vector<16x128xf32>, vector<128x128xf32>, vector<16x128xf32> -> vector<16x128xf32>
    %7 = vector.broadcast %3 : vector<1x128xf32> to vector<16x128xf32>
    %8 = arith.addf %6, %7 : vector<16x128xf32>
    %cst_10 = arith.constant dense<0.000000e+00> : vector<16x128xf32>
    %9 = tpu.matmul %1, %4, %cst_10 {dimension_numbers = #tpu.dot_dimension_numbers<[1], [0], [0], [1], [0, 0, 1, 1], [], []>} : vector<16x128xf32>, vector<128x128xf32>, vector<16x128xf32> -> vector<16x128xf32>
    %10 = arith.addf %8, %9 : vector<16x128xf32>
    %11 = arith.mulf %10, %10 : vector<16x128xf32>
    %cst_11 = arith.constant dense<0.000000e+00> : vector<16xf32>
    %12 = vector.multi_reduction <add>, %11, %cst_11 [1] : vector<16x128xf32> to vector<16xf32>
    %13 = vector.shape_cast %12 : vector<16xf32> to vector<16x1xf32>
    %cst_12 = arith.constant 1.000000e-24 : f32
    %14 = vector.broadcast %cst_12 : f32 to vector<16x1xf32>
    %15 = arith.maximumf %13, %14 : vector<16x1xf32>
    %16 = math.rsqrt %15 : vector<16x1xf32>
    %17 = vector.broadcast %16 : vector<16x1xf32> to vector<16x128xf32>
    %18 = arith.mulf %10, %17 : vector<16x128xf32>
    %19 = math.tanh %18 : vector<16x128xf32>
    %c0_13 = arith.constant 0 : index
    %c0_14 = arith.constant 0 : index
    %20 = vector.load %arg6[%c0_13, %c0_14] : memref<128x128xf32, #tpu.memory_space<vmem>>, vector<128x128xf32>
    %c0_15 = arith.constant 0 : index
    %c0_16 = arith.constant 0 : index
    %21 = vector.load %arg7[%c0_15, %c0_16] : memref<1x128xf32, #tpu.memory_space<vmem>>, vector<1x128xf32>
    %c0_17 = arith.constant 0 : index
    %c0_18 = arith.constant 0 : index
    %22 = vector.load %arg8[%c0_17, %c0_18] : memref<128x128xf32, #tpu.memory_space<vmem>>, vector<128x128xf32>
    %cst_19 = arith.constant dense<0.000000e+00> : vector<16x128xf32>
    %23 = tpu.matmul %0, %19, %cst_19 {dimension_numbers = #tpu.dot_dimension_numbers<[1], [0], [0], [1], [0, 0, 1, 1], [], []>} : vector<16x16xf32>, vector<16x128xf32>, vector<16x128xf32> -> vector<16x128xf32>
    %cst_20 = arith.constant dense<0.000000e+00> : vector<16x128xf32>
    %24 = tpu.matmul %23, %20, %cst_20 {dimension_numbers = #tpu.dot_dimension_numbers<[1], [0], [0], [1], [0, 0, 1, 1], [], []>} : vector<16x128xf32>, vector<128x128xf32>, vector<16x128xf32> -> vector<16x128xf32>
    %25 = vector.broadcast %21 : vector<1x128xf32> to vector<16x128xf32>
    %26 = arith.addf %24, %25 : vector<16x128xf32>
    %cst_21 = arith.constant dense<0.000000e+00> : vector<16x128xf32>
    %27 = tpu.matmul %19, %22, %cst_21 {dimension_numbers = #tpu.dot_dimension_numbers<[1], [0], [0], [1], [0, 0, 1, 1], [], []>} : vector<16x128xf32>, vector<128x128xf32>, vector<16x128xf32> -> vector<16x128xf32>
    %28 = arith.addf %26, %27 : vector<16x128xf32>
    %29 = arith.mulf %28, %28 : vector<16x128xf32>
    %cst_22 = arith.constant dense<0.000000e+00> : vector<16xf32>
    %30 = vector.multi_reduction <add>, %29, %cst_22 [1] : vector<16x128xf32> to vector<16xf32>
    %31 = vector.shape_cast %30 : vector<16xf32> to vector<16x1xf32>
    %cst_23 = arith.constant 1.000000e-24 : f32
    %32 = vector.broadcast %cst_23 : f32 to vector<16x1xf32>
    %33 = arith.maximumf %31, %32 : vector<16x1xf32>
    %34 = math.rsqrt %33 : vector<16x1xf32>
    %35 = vector.broadcast %34 : vector<16x1xf32> to vector<16x128xf32>
    %36 = arith.mulf %28, %35 : vector<16x128xf32>
    %37 = math.tanh %36 : vector<16x128xf32>
    %c0_24 = arith.constant 0 : index
    %c0_25 = arith.constant 0 : index
    %38 = vector.load %arg9[%c0_24, %c0_25] : memref<128x128xf32, #tpu.memory_space<vmem>>, vector<128x128xf32>
    %c0_26 = arith.constant 0 : index
    %c0_27 = arith.constant 0 : index
    %39 = vector.load %arg10[%c0_26, %c0_27] : memref<1x128xf32, #tpu.memory_space<vmem>>, vector<1x128xf32>
    %cst_28 = arith.constant dense<0.000000e+00> : vector<16x128xf32>
    %40 = tpu.matmul %37, %38, %cst_28 {dimension_numbers = #tpu.dot_dimension_numbers<[1], [0], [0], [1], [0, 0, 1, 1], [], []>} : vector<16x128xf32>, vector<128x128xf32>, vector<16x128xf32> -> vector<16x128xf32>
    %41 = vector.broadcast %39 : vector<1x128xf32> to vector<16x128xf32>
    %42 = arith.addf %40, %41 : vector<16x128xf32>
    %cst_29 = arith.constant dense<0xFF800000> : vector<16xf32>
    %43 = vector.multi_reduction <maximumf>, %42, %cst_29 [1] : vector<16x128xf32> to vector<16xf32>
    %44 = vector.shape_cast %43 : vector<16xf32> to vector<16x1xf32>
    %45 = vector.broadcast %44 : vector<16x1xf32> to vector<16x128xf32>
    %46 = arith.subf %42, %45 : vector<16x128xf32>
    %47 = math.exp %46 : vector<16x128xf32>
    %cst_30 = arith.constant dense<0.000000e+00> : vector<16xf32>
    %48 = vector.multi_reduction <add>, %47, %cst_30 [1] : vector<16x128xf32> to vector<16xf32>
    %49 = vector.shape_cast %48 : vector<16xf32> to vector<16x1xf32>
    %50 = math.log %49 : vector<16x1xf32>
    %51 = arith.addf %44, %50 : vector<16x1xf32>
    %52 = vector.broadcast %51 : vector<16x1xf32> to vector<16x128xf32>
    %53 = arith.subf %42, %52 : vector<16x128xf32>
    %c0_31 = arith.constant 0 : index
    %c0_32 = arith.constant 0 : index
    %54 = vector.load %arg11[%c0_31, %c0_32] : memref<16x128xf32, #tpu.memory_space<vmem>>, vector<16x128xf32>
    tpu.vector_store %arg11[%c0_31, %c0_32], %53 {strides = array<i32>} : memref<16x128xf32, #tpu.memory_space<vmem>>, vector<16x128xf32>,
    %c0_33 = arith.constant 0 : index
    %c0_34 = arith.constant 0 : index
    %55 = vector.load %arg12[%c0_33, %c0_34] : memref<16x128xf32, #tpu.memory_space<vmem>>, vector<16x128xf32>
    tpu.vector_store %arg12[%c0_33, %c0_34], %37 {strides = array<i32>} : memref<16x128xf32, #tpu.memory_space<vmem>>, vector<16x128xf32>,
    return
  }
  func.func @transform_0(%arg0: i32) -> (i32, i32) {
    %c0_i32 = arith.constant 0 : i32
    %c0_i32_0 = arith.constant 0 : i32
    %c0_i32_1 = arith.constant 0 : i32
    return %c0_i32, %c0_i32_0 : i32, i32
  }
  func.func @transform_1(%arg0: i32) -> (i32, i32) {
    %c0_i32 = arith.constant 0 : i32
    %c0_i32_0 = arith.constant 0 : i32
    %c0_i32_1 = arith.constant 0 : i32
    return %c0_i32, %c0_i32_0 : i32, i32
  }
  func.func @transform_2(%arg0: i32) -> (i32, i32) {
    %c0_i32 = arith.constant 0 : i32
    %c0_i32_0 = arith.constant 0 : i32
    %c0_i32_1 = arith.constant 0 : i32
    return %c0_i32, %c0_i32_0 : i32, i32
  }
  func.func @transform_3(%arg0: i32) -> (i32, i32) {
    %c0_i32 = arith.constant 0 : i32
    %c0_i32_0 = arith.constant 0 : i32
    %c0_i32_1 = arith.constant 0 : i32
    return %c0_i32, %c0_i32_0 : i32, i32
  }
  func.func @transform_4(%arg0: i32) -> (i32, i32) {
    %c0_i32 = arith.constant 0 : i32
    %c0_i32_0 = arith.constant 0 : i32
    %c0_i32_1 = arith.constant 0 : i32
    return %c0_i32, %c0_i32_0 : i32, i32
  }
  func.func @transform_5(%arg0: i32) -> (i32, i32) {
    %c0_i32 = arith.constant 0 : i32
    %c0_i32_0 = arith.constant 0 : i32
    %c0_i32_1 = arith.constant 0 : i32
    return %c0_i32, %c0_i32_0 : i32, i32
  }
  func.func @transform_6(%arg0: i32) -> (i32, i32) {
    %c0_i32 = arith.constant 0 : i32
    %c0_i32_0 = arith.constant 0 : i32
    %c0_i32_1 = arith.constant 0 : i32
    return %c0_i32, %c0_i32_0 : i32, i32
  }
  func.func @transform_7(%arg0: i32) -> (i32, i32) {
    %c0_i32 = arith.constant 0 : i32
    %c0_i32_0 = arith.constant 0 : i32
    %c0_i32_1 = arith.constant 0 : i32
    return %c0_i32, %c0_i32_0 : i32, i32
  }
  func.func @transform_8(%arg0: i32) -> (i32, i32) {
    %c0_i32 = arith.constant 0 : i32
    %c0_i32_0 = arith.constant 0 : i32
    %c0_i32_1 = arith.constant 0 : i32
    return %c0_i32, %c0_i32_0 : i32, i32
  }
  func.func @transform_9(%arg0: i32) -> (i32, i32) {
    %c0_i32 = arith.constant 0 : i32
    %c0_i32_0 = arith.constant 0 : i32
    %c0_i32_1 = arith.constant 0 : i32
    return %c0_i32, %c0_i32_0 : i32, i32
  }
  func.func @transform_10(%arg0: i32) -> (i32, i32) {
    %c0_i32 = arith.constant 0 : i32
    %c0_i32_0 = arith.constant 0 : i32
    %c0_i32_1 = arith.constant 0 : i32
    return %c0_i32, %c0_i32_0 : i32, i32
  }
  func.func @transform_11(%arg0: i32) -> (i32, i32) {
    %c0_i32 = arith.constant 0 : i32
    %c0_i32_0 = arith.constant 0 : i32
    %c0_i32_1 = arith.constant 0 : i32
    return %c0_i32, %c0_i32_0 : i32, i32
  }
}

</mosaic_0001>

<bundles_post_ra>
// kernel: tpu_custom_call.1
= control target key start
LH: loop header
LB: loop body
LE: loop exit
PB: predicated region body
PF: predicated region fallthrough
CT: control target
= control target key end

     0   :  { %17 = vsyncpa [#allocation3], 0  ;;  %s1836_s0 = inlined_call_operand.hbm [shape: f32[16,16], index: 0, kind: input, shape index: {}]   ;;  %s1837_s1 = inlined_call_operand.hbm [shape: f32[16,128], index: 1, kind: input, shape index: {}]   ;;  %s1838_s2 = inlined_call_operand.hbm [shape: f32[128,128], index: 2, kind: input, shape index: {}]   ;;  %s1839_s3 = inlined_call_operand.vmem [shape: f32[1,128], index: 3, kind: input, shape index: {}]   ;;  %s1840_s4 = inlined_call_operand.hbm [shape: f32[128,128], index: 4, kind: input, shape index: {}]   ;;  %s1841_s5 = inlined_call_operand.hbm [shape: f32[128,128], index: 5, kind: input, shape index: {}]   ;;  %s1842_s6 = inlined_call_operand.vmem [shape: f32[1,128], index: 6, kind: input, shape index: {}]   ;;  %s1843_s7 = inlined_call_operand.hbm [shape: f32[128,128], index: 7, kind: input, shape index: {}]   ;;  %s1844_s8 = inlined_call_operand.hbm [shape: f32[128,128], index: 8, kind: input, shape index: {}]   ;;  %s1845_s9 = inlined_call_operand.vmem [shape: f32[1,128], index: 9, kind: input, shape index: {}]   ;;  %s1846_s10 = inlined_call_operand.hbm [shape: f32[16,128], index: 10, kind: output, shape index: {0}]   ;;  %s1847_s11 = inlined_call_operand.hbm [shape: f32[16,128], index: 11, kind: output, shape index: {1}]  }
   0x1   :  { %18 = vsyncpa [#allocation6], 0 }
   0x2   :  { %19 = vsyncpa [#allocation9], 0 }
   0x3   :  { %20 = vsyncpa [#allocation12], 0 }
   0x4   :  { %21 = vsyncpa [#allocation4], 0 }
   0x5   :  { %22 = vsyncpa [#allocation16], 0  ;;  %s1580_s17 = smov [#allocation5]   ;;  %s1581_s19 = smov [#allocation8]  }
   0x6   :  { %s40_s18 = sshll.u32 %s1580_s17, 4  ;;  %s66_s20 = sshll.u32 %s1581_s19, 4  ;;  %s41_s18 = int_to_ptr.vmem [resolvable:$true] %s40_s18  ;;  %s1651_s20 = int_to_ptr.vmem [resolvable:$true] %s66_s20 }
   0x7   :  { %s1370_s23 = scalar_lea.hbm %s1837_s1, 256 }
   0x8   :  { %p1371_p0 = scmp.ne.s32.totalorder %s1837_s1, %s1370_s23  ;;  %p1374_p1 = scmp.lt.u32.totalorder %s1370_s23, %s1837_s1 }
   0xa   :  { %p1376_p2 = pnand %p1374_p1, %p1371_p0 }
   0xc   :  { %1379 = shalt.err (!%p1376_p2)
}
   0xd   :  { %s1380_s28 = scalar_lea.vmem %s41_s18, 256  ;;  %p1385_p4 = scmp.lt.s32.totalorder %s41_s18, %s41_s18 }
   0xe   :  { %p1381_p3 = scmp.ne.s32.totalorder %s41_s18, %s1380_s28  ;;  %p1386_p5 = scmp.lt.s32.totalorder %s1380_s28, %s1380_s28 }
  0x10   :  { %p1387_p6 = por %p1386_p5, %p1385_p4 }
  0x12   :  { %p1388_p7 = pnand %p1387_p6, %p1381_p3 }
  0x14   :  { %1391 = shalt.err (!%p1388_p7)
}
  0x15   :  { %s1582_s29 = smov 128   ;;  %s1583_s30 = smov 8  }
  0x16   :  { %46 = dma.hbm_to_vmem [thread:$0]  %s1837_s1, 256, %s41_s18, [#allocation6], %s1582_s29, %s1582_s29, %s1583_s30  }
  0x17   :  { %s1392_s16 = scalar_lea.hbm %s1840_s4, 2048 }
  0x18   :  { %p1393_p8 = scmp.ne.s32.totalorder %s1840_s4, %s1392_s16  ;;  %p1396_p9 = scmp.lt.u32.totalorder %s1392_s16, %s1840_s4 }
  0x1a   :  { %p1398_p10 = pnand %p1396_p9, %p1393_p8 }
  0x1c   :  { %1401 = shalt.err (!%p1398_p10)
}
  0x1d   :  { %s1402_s23 = scalar_lea.vmem %s1651_s20, 2048  ;;  %p1407_p12 = scmp.lt.s32.totalorder %s1651_s20, %s1651_s20 }
  0x1e   :  { %p1403_p11 = scmp.ne.s32.totalorder %s1651_s20, %s1402_s23  ;;  %p1408_p13 = scmp.lt.s32.totalorder %s1402_s23, %s1402_s23 }
  0x20   :  { %p1409_p0 = por %p1408_p13, %p1407_p12 }
  0x22   :  { %p1410_p1 = pnand %p1409_p0, %p1403_p11 }
  0x24   :  { %1413 = shalt.err (!%p1410_p1)
}
  0x25   :  { %72 = dma.hbm_to_vmem [thread:$0]  %s1840_s4, 2048, %s1651_s20, [#allocation9], %s1582_s29, %s1582_s29, %s1583_s30  }
  0x26   :  { %s1584_s24 = smov [#allocation11]   ;;  %s1585_s26 = smov [#allocation2]  }
  0x27   :  { %s92_s25 = sshll.u32 %s1584_s24, 4  ;;  %s28_s27 = sshll.u32 %s1585_s26, 4  ;;  %s93_s25 = int_to_ptr.vmem [resolvable:$true] %s92_s25  ;;  %s1688_s27 = int_to_ptr.vmem [resolvable:$true] %s28_s27 }
  0x28   :  { %s1414_s13 = scalar_lea.hbm %s1843_s7, 2048 }
  0x29   :  { %p1415_p2 = scmp.ne.s32.totalorder %s1843_s7, %s1414_s13  ;;  %p1418_p3 = scmp.lt.u32.totalorder %s1414_s13, %s1843_s7 }
  0x2b   :  { %p1420_p4 = pnand %p1418_p3, %p1415_p2 }
  0x2d   :  { %1423 = shalt.err (!%p1420_p4)
}
  0x2e   :  { %s1424_s4 = scalar_lea.vmem %s93_s25, 2048  ;;  %p1429_p6 = scmp.lt.s32.totalorder %s93_s25, %s93_s25 }
  0x2f   :  { %p1425_p5 = scmp.ne.s32.totalorder %s93_s25, %s1424_s4  ;;  %p1430_p7 = scmp.lt.s32.totalorder %s1424_s4, %s1424_s4 }
  0x31   :  { %p1431_p8 = por %p1430_p7, %p1429_p6 }
  0x33   :  { %p1432_p9 = pnand %p1431_p8, %p1425_p5 }
  0x35   :  { %1435 = shalt.err (!%p1432_p9)
}
  0x36   :  { %98 = dma.hbm_to_vmem [thread:$0]  %s1843_s7, 2048, %s93_s25, [#allocation12], %s1582_s29, %s1582_s29, %s1583_s30  }
  0x37   :  { %s1436_s23 = scalar_lea.hbm %s1836_s0, 256 }
  0x38   :  { %p1437_p10 = scmp.ne.s32.totalorder %s1836_s0, %s1436_s23  ;;  %p1440_p11 = scmp.lt.u32.totalorder %s1436_s23, %s1836_s0 }
  0x3a   :  { %p1442_p12 = pnand %p1440_p11, %p1437_p10 }
  0x3c   :  { %1445 = shalt.err (!%p1442_p12)
}
  0x3d   :  { %s1446_s28 = scalar_lea.vmem %s1688_s27, 256  ;;  %p1451_p0 = scmp.lt.s32.totalorder %s1688_s27, %s1688_s27 }
  0x3e   :  { %p1447_p13 = scmp.ne.s32.totalorder %s1688_s27, %s1446_s28  ;;  %p1452_p1 = scmp.lt.s32.totalorder %s1446_s28, %s1446_s28 }
  0x40   :  { %p1453_p2 = por %p1452_p1, %p1451_p0 }
  0x42   :  { %p1454_p3 = pnand %p1453_p2, %p1447_p13 }
  0x44   :  { %1457 = shalt.err (!%p1454_p3)
}
  0x45   :  { %34 = dma.hbm_to_vmem [thread:$0]  %s1836_s0, 256, %s1688_s27, [#allocation3], %s1582_s29, %s1582_s29, %s1583_s30  }
  0x46   :  { %s1586_s12 = smov [#allocation7]   ;;  %s1587_s14 = smov [#allocation10]  }
  0x47   :  { %s52_s13 = sshll.u32 %s1586_s12, 4  ;;  %s78_s15 = sshll.u32 %s1587_s14, 4  ;;  %s53_s13 = int_to_ptr.vmem [resolvable:$true] %s52_s13  ;;  %s1725_s15 = int_to_ptr.vmem [resolvable:$true] %s78_s15 }
  0x48   :  { %s1458_s4 = scalar_lea.hbm %s1838_s2, 2048 }
  0x49   :  { %p1459_p4 = scmp.ne.s32.totalorder %s1838_s2, %s1458_s4  ;;  %p1462_p5 = scmp.lt.u32.totalorder %s1458_s4, %s1838_s2 }
  0x4b   :  { %p1464_p6 = pnand %p1462_p5, %p1459_p4 }
  0x4d   :  { %1467 = shalt.err (!%p1464_p6)
}
  0x4e   :  { %s1468_s0 = scalar_lea.vmem %s53_s13, 2048  ;;  %p1473_p8 = scmp.lt.s32.totalorder %s53_s13, %s53_s13 }
  0x4f   :  { %p1469_p7 = scmp.ne.s32.totalorder %s53_s13, %s1468_s0  ;;  %p1474_p9 = scmp.lt.s32.totalorder %s1468_s0, %s1468_s0 }
  0x51   :  { %p1475_p10 = por %p1474_p9, %p1473_p8 }
  0x53   :  { %p1476_p11 = pnand %p1475_p10, %p1469_p7 }
  0x55   :  { %1479 = shalt.err (!%p1476_p11)
}
  0x56   :  { %58 = dma.hbm_to_vmem [thread:$0]  %s1838_s2, 2048, %s53_s13, [#allocation6], %s1582_s29, %s1582_s29, %s1583_s30  }
  0x57   :  { %s1480_s24 = scalar_lea.hbm %s1841_s5, 2048 }
  0x58   :  { %p1481_p12 = scmp.ne.s32.totalorder %s1841_s5, %s1480_s24  ;;  %p1484_p13 = scmp.lt.u32.totalorder %s1480_s24, %s1841_s5 }
  0x5a   :  { %p1486_p0 = pnand %p1484_p13, %p1481_p12 }
  0x5c   :  { %1489 = shalt.err (!%p1486_p0)
}
  0x5d   :  { %s1490_s12 = scalar_lea.vmem %s1725_s15, 2048  ;;  %p1495_p2 = scmp.lt.s32.totalorder %s1725_s15, %s1725_s15 }
  0x5e   :  { %p1491_p1 = scmp.ne.s32.totalorder %s1725_s15, %s1490_s12  ;;  %p1496_p3 = scmp.lt.s32.totalorder %s1490_s12, %s1490_s12 }
  0x60   :  { %p1497_p4 = por %p1496_p3, %p1495_p2 }
  0x62   :  { %p1498_p5 = pnand %p1497_p4, %p1491_p1 }
  0x64   :  { %1501 = shalt.err (!%p1498_p5)
}
  0x65   :  { %84 = dma.hbm_to_vmem [thread:$0]  %s1841_s5, 2048, %s1725_s15, [#allocation9], %s1582_s29, %s1582_s29, %s1583_s30  }
  0x66   :  { %s1588_s14 = smov [#allocation13]   ;;  %s1502_s20 = scalar_lea.hbm %s1844_s8, 2048 }
  0x67   :  { %s104_s16 = sshll.u32 %s1588_s14, 4  ;;  %p1503_p6 = scmp.ne.s32.totalorder %s1844_s8, %s1502_s20  ;;  %s105_s16 = int_to_ptr.vmem [resolvable:$true] %s104_s16 }
  0x68   :  { %p1506_p7 = scmp.lt.u32.totalorder %s1502_s20, %s1844_s8 }
  0x6a   :  { %p1508_p8 = pnand %p1506_p7, %p1503_p6 }
  0x6c   :  { %1511 = shalt.err (!%p1508_p8)
}
  0x6d   :  { %s1512_s27 = scalar_lea.vmem %s105_s16, 2048  ;;  %p1517_p10 = scmp.lt.s32.totalorder %s105_s16, %s105_s16 }
  0x6e   :  { %p1513_p9 = scmp.ne.s32.totalorder %s105_s16, %s1512_s27  ;;  %p1518_p11 = scmp.lt.s32.totalorder %s1512_s27, %s1512_s27 }
  0x70   :  { %p1519_p12 = por %p1518_p11, %p1517_p10 }
  0x72   :  { %p1520_p13 = pnand %p1519_p12, %p1513_p9 }
  0x74   :  { %1523 = shalt.err (!%p1520_p13)
}
  0x75   :  { %110 = dma.hbm_to_vmem [thread:$0]  %s1844_s8, 2048, %s105_s16, [#allocation12], %s1582_s29, %s1582_s29, %s1583_s30  }
  0x76   :  { %1568 = dma.done.wait [#allocation3], 256  }
  0x77   :  { %1569 = vsyncadd [#allocation3], 4294967040 }
  0x78   :  { %1570 = dma.done.wait [#allocation6], 2304  }
  0x79   :  { %1571 = vsyncadd [#allocation6], 4294964992 }
  0x7a   :  { %1572 = dma.done.wait [#allocation9], 4096  }
  0x7b   :  { %1573 = vsyncadd [#allocation9], 4294963200 }
  0x7c   :  { %1574 = dma.done.wait [#allocation12], 4096  }
  0x7d   :  { %1575 = vsyncadd [#allocation12], 4294963200  ;;  %vm171_vm0 = vcmask 130048   ;;  %v1777_v0 = vld [vmem:[#allocation5] sm:$0xff]  ;;  %v1779_v1 = vld [vmem:[#allocation5 + $0x8] sm:$0xff]  ;;  %s1589_s24 = smov [#allocation15]  }
  0x7e   :  { %v134_v2 = vld [vmem:[#allocation2] sm:$0xff]  ;;  %v1159_v3 = vpack.c.bf16 %v1779_v1, %v1777_v0  ;;  %v139_v5 = vld [vmem:[#allocation7 + $0x8] sm:$0xff]  ;;  %v140_v7 = vld [vmem:[#allocation7 + $0x10] sm:$0xff] }
  0x7f   :  { %974 = vmatprep.mubr.msk.f32.mxu0 %vm171_vm0, %v134_v2  ;;  %v138_v4 = vld [vmem:[#allocation7] sm:$0xff]  ;;  %v141_v8 = vld [vmem:[#allocation7 + $0x18] sm:$0xff]  ;;  %v143_v11 = vld [vmem:[#allocation7 + $0x28] sm:$0xff] }
  0x80   :  { %v1163_v6 = vpack.c.bf16 %v139_v5, %v138_v4  ;;  %1160 = vmatprep.subr.bf16.mxu0 %v1159_v3  ;;  %v1167_v9 = vpack.c.bf16 %v141_v8, %v140_v7  ;;  %v142_v10 = vld [vmem:[#allocation7 + $0x20] sm:$0xff]  ;;  %v1784_v12 = vld [vmem:[#allocation2 + $0x8] sm:$0xff]  ;;  %v144_v14 = vld [vmem:[#allocation7 + $0x30] sm:$0xff] }
  0x81   :  { %1162 = vmatpush3.bf16.msra.mxu0 %v1159_v3  ;;  %v1171_v13 = vpack.c.bf16 %v143_v11, %v142_v10  ;;  %v145_v15 = vld [vmem:[#allocation7 + $0x38] sm:$0xff]  ;;  %v146_v17 = vld [vmem:[#allocation7 + $0x40] sm:$0xff]  ;;  %v147_v18 = vld [vmem:[#allocation7 + $0x48] sm:$0xff] }
  0x82   :  { %1164 = vmatprep.subr.bf16.mxu1 %v1163_v6  ;;  %v1175_v16 = vpack.c.bf16 %v145_v15, %v144_v14  ;;  %v1179_v19 = vpack.c.bf16 %v147_v18, %v146_v17  ;;  %v148_v20 = vld [vmem:[#allocation7 + $0x50] sm:$0xff]  ;;  %v149_v21 = vld [vmem:[#allocation7 + $0x58] sm:$0xff]  ;;  %v150_v23 = vld [vmem:[#allocation7 + $0x60] sm:$0xff] }
  0x83   :  { %1166 = vmatpush3.bf16.msra.mxu1 %v1163_v6  ;;  %v1183_v22 = vpack.c.bf16 %v149_v21, %v148_v20  ;;  %v151_v24 = vld [vmem:[#allocation7 + $0x68] sm:$0xff]  ;;  %v152_v26 = vld [vmem:[#allocation7 + $0x70] sm:$0xff]  ;;  %v153_v27 = vld [vmem:[#allocation7 + $0x78] sm:$0xff] }
  0x84   :  { %1168 = vmatprep.subr.bf16.mxu1 %v1167_v9  ;;  %975 = vmatmul.mubr.msk.f32.vlgmr.msra.gmra.mrb[0].mxu0 %vm171_vm0, %v1784_v12  ;;  %v1187_v25 = vpack.c.bf16 %v151_v24, %v150_v23  ;;  %v1191_v28 = vpack.c.bf16 %v153_v27, %v152_v26  ;;  %v155_v29 = vld [vmem:[#allocation8] sm:$0xff]  ;;  %v156_v30 = vld [vmem:[#allocation8 + $0x8] sm:$0xff]  ;;  %v157_v32 = vld [vmem:[#allocation8 + $0x10] sm:$0xff] }
  0x85   :  { %1051 = vmatprep.mubr.msk.f32.mxu0 %vm171_vm0, %v134_v2  ;;  %v1195_v31 = vpack.c.bf16 %v156_v30, %v155_v29  ;;  %v158_v33 = vld [vmem:[#allocation8 + $0x18] sm:$0xff]  ;;  %v159_v37 = vld [vmem:[#allocation8 + $0x20] sm:$0xff]  ;;  %v160_v38 = vld [vmem:[#allocation8 + $0x28] sm:$0xff] }
  0x86   :  { %v1199_v36 = vpack.c.bf16 %v158_v33, %v157_v32  ;;  %v1203_v39 = vpack.c.bf16 %v160_v38, %v159_v37  ;;  %v161_v40 = vld [vmem:[#allocation8 + $0x30] sm:$0xff]  ;;  %v162_v41 = vld [vmem:[#allocation8 + $0x38] sm:$0xff]  ;;  %v163_v43 = vld [vmem:[#allocation8 + $0x40] sm:$0xff] }
  0x87   :  { %1170 = vmatpush3.bf16.msra.mxu1 %v1167_v9  ;;  %v1207_v42 = vpack.c.bf16 %v162_v41, %v161_v40  ;;  %v164_v44 = vld [vmem:[#allocation8 + $0x48] sm:$0xff]  ;;  %v165_v46 = vld [vmem:[#allocation8 + $0x50] sm:$0xff]  ;;  %v166_v47 = vld [vmem:[#allocation8 + $0x58] sm:$0xff] }
  0x88   :  { %1172 = vmatprep.subr.bf16.mxu1 %v1171_v13  ;;  %v1211_v45 = vpack.c.bf16 %v164_v44, %v163_v43  ;;  %v1215_v48 = vpack.c.bf16 %v166_v47, %v165_v46  ;;  %v167_v49 = vld [vmem:[#allocation8 + $0x60] sm:$0xff]  ;;  %v168_v50 = vld [vmem:[#allocation8 + $0x68] sm:$0xff]  ;;  %v169_v52 = vld [vmem:[#allocation8 + $0x70] sm:$0xff] }
  0x89   :  { %v1219_v51 = vpack.c.bf16 %v168_v50, %v167_v49  ;;  %v170_v53 = vld [vmem:[#allocation8 + $0x78] sm:$0xff]  ;;  %v867_v55 = vld [vmem:[%s1839_s3] ss:$0 sm:$0xff]  ;;  %v426_v7 = vld [vmem:[#allocation10 + $0x8] sm:$0xff] }
  0x8a   :  { %v1223_v54 = vpack.c.bf16 %v170_v53, %v169_v52  ;;  %v425_v6 = vld [vmem:[#allocation10] sm:$0xff]  ;;  %v428_v14 = vld [vmem:[#allocation10 + $0x18] sm:$0xff]  ;;  %v430_v17 = vld [vmem:[#allocation10 + $0x28] sm:$0xff] }
  0x8b   :  { %1174 = vmatpush3.bf16.msra.mxu1 %v1171_v13  ;;  %v1231_v11 = vpack.c.bf16 %v426_v7, %v425_v6  ;;  %v427_v13 = vld [vmem:[#allocation10 + $0x10] sm:$0xff]  ;;  %v432_v20 = vld [vmem:[#allocation10 + $0x38] sm:$0xff]  ;;  %v434_v23 = vld [vmem:[#allocation10 + $0x48] sm:$0xff] }
  0x8c   :  { %1176 = vmatprep.subr.bf16.mxu1 %v1175_v16  ;;  %v1235_v15 = vpack.c.bf16 %v428_v14, %v427_v13  ;;  %v436_v26 = vld [vmem:[#allocation10 + $0x58] sm:$0xff]  ;;  %v439_v30 = vld [vmem:[#allocation10 + $0x70] sm:$0xff]  ;;  %v442_v33 = vld [vmem:[#allocation11] sm:$0xff] }
  0x8d   :  { %v445_v37 = vld [vmem:[#allocation11 + $0x18] sm:$0xff]  ;;  %v446_v41 = vld [vmem:[#allocation11 + $0x20] sm:$0xff]  ;;  %v448_v44 = vld [vmem:[#allocation11 + $0x30] sm:$0xff] }
  0x8e   :  { %v450_v47 = vld [vmem:[#allocation11 + $0x40] sm:$0xff]  ;;  %v452_v50 = vld [vmem:[#allocation11 + $0x50] sm:$0xff]  ;;  %v708_v6 = vld [vmem:[#allocation13 + $0x18] sm:$0xff] }
  0x8f   :  { %1178 = vmatpush3.bf16.msra.mxu1 %v1175_v16  ;;  %v429_v16 = vld [vmem:[#allocation10 + $0x20] sm:$0xff]  ;;  %v712_v13 = vld [vmem:[#allocation13 + $0x38] sm:$0xff] }
  0x90   :  { %1180 = vmatprep.subr.bf16.mxu1 %v1179_v19  ;;  %v1239_v18 = vpack.c.bf16 %v430_v17, %v429_v16  ;;  %v454_v53 = vld [vmem:[#allocation11 + $0x60] sm:$0xff]  ;;  %v714_v16 = vld [vmem:[#allocation13 + $0x48] sm:$0xff] }
  0x93   :  { %1182 = vmatpush3.bf16.msra.mxu1 %v1179_v19  ;;  %v431_v19 = vld [vmem:[#allocation10 + $0x30] sm:$0xff] }
  0x94   :  { %1184 = vmatprep.subr.bf16.mxu1 %v1183_v22  ;;  %v1243_v21 = vpack.c.bf16 %v432_v20, %v431_v19  ;;  %v716_v19 = vld [vmem:[#allocation13 + $0x58] sm:$0xff] }
  0x97   :  { %1186 = vmatpush3.bf16.msra.mxu1 %v1183_v22  ;;  %v433_v22 = vld [vmem:[#allocation10 + $0x40] sm:$0xff] }
  0x98   :  { %1188 = vmatprep.subr.bf16.mxu1 %v1187_v25  ;;  %v1247_v24 = vpack.c.bf16 %v434_v23, %v433_v22  ;;  %v718_v22 = vld [vmem:[#allocation13 + $0x68] sm:$0xff] }
  0x9b   :  { %1190 = vmatpush3.bf16.msra.mxu1 %v1187_v25  ;;  %v435_v25 = vld [vmem:[#allocation10 + $0x50] sm:$0xff] }
  0x9c   :  { %1192 = vmatprep.subr.bf16.mxu1 %v1191_v28  ;;  %v1251_v27 = vpack.c.bf16 %v436_v26, %v435_v25  ;;  %v720_v25 = vld [vmem:[#allocation13 + $0x78] sm:$0xff] }
  0x9f   :  { %1194 = vmatpush3.bf16.msra.mxu1 %v1191_v28  ;;  %v437_v28 = vld [vmem:[#allocation10 + $0x60] sm:$0xff] }
  0xa0   :  { %1196 = vmatprep.subr.bf16.mxu1 %v1195_v31 }
 0x157   :  { %v976_v34 = vpop.f32.mrb[0].mxu0 }
 0x158   :  { %v244_v35 = vpop.f32.mrb[1].mxu0 }
 0x159   :  { %1009 = vmatprep.mubr.f32.mxu1 %v244_v35 }
 0x15a   :  { %1010 = vmatmul.mubr.f32.vlgmr.msra.gmra.mrb[0].mxu1 %v976_v34  ;;  %v443_v34 = vld [vmem:[#allocation11 + $0x8] sm:$0xff] }
 0x15b   :  { %1198 = vmatpush3.bf16.msra.mxu1 %v1195_v31  ;;  %1044 = vmatprep.mubr.f32.mxu1 %v1777_v0  ;;  %v440_v31 = vld [vmem:[#allocation10 + $0x78] sm:$0xff]  ;;  %v1263_v35 = vpack.c.bf16 %v443_v34, %v442_v33 }
 0x15c   :  { %1200 = vmatprep.subr.bf16.mxu1 %v1199_v36  ;;  %v1259_v32 = vpack.c.bf16 %v440_v31, %v439_v30 }
 0x15f   :  { %1202 = vmatpush3.bf16.msra.mxu1 %v1199_v36  ;;  %v444_v36 = vld [vmem:[#allocation11 + $0x10] sm:$0xff] }
 0x160   :  { %1204 = vmatprep.subr.bf16.mxu1 %v1203_v39  ;;  %v1267_v40 = vpack.c.bf16 %v445_v37, %v444_v36  ;;  %v871_v36 = vld [vmem:[%s1845_s9] ss:$0 sm:$0xff]  ;;  %s846_s9 = sshll.u32 %s1589_s24, 4  ;;  %s847_s9 = int_to_ptr.vmem [resolvable:$true] %s846_s9 }
 0x161   :  { %s1524_s26 = scalar_lea.vmem %s847_s9, 256  ;;  %p1529_p1 = scmp.lt.s32.totalorder %s847_s9, %s847_s9 }
 0x162   :  { %p1525_p0 = scmp.ne.s32.totalorder %s847_s9, %s1524_s26  ;;  %p1530_p2 = scmp.lt.s32.totalorder %s1524_s26, %s1524_s26 }
 0x163   :  { %1206 = vmatpush3.bf16.msra.mxu1 %v1203_v39 }
 0x164   :  { %1208 = vmatprep.subr.bf16.mxu1 %v1207_v42  ;;  %p1531_p3 = por %p1530_p2, %p1529_p1 }
 0x166   :  { %p1532_p4 = pnand %p1531_p3, %p1525_p0 }
 0x167   :  { %1210 = vmatpush3.bf16.msra.mxu1 %v1207_v42  ;;  %v447_v42 = vld [vmem:[#allocation11 + $0x28] sm:$0xff] }
 0x168   :  { %1212 = vmatprep.subr.bf16.mxu1 %v1211_v45  ;;  %v1271_v43 = vpack.c.bf16 %v447_v42, %v446_v41 }
 0x16b   :  { %1214 = vmatpush3.bf16.msra.mxu1 %v1211_v45  ;;  %v449_v45 = vld [vmem:[#allocation11 + $0x38] sm:$0xff] }
 0x16c   :  { %1216 = vmatprep.subr.bf16.mxu1 %v1215_v48  ;;  %v1275_v46 = vpack.c.bf16 %v449_v45, %v448_v44 }
 0x16f   :  { %1218 = vmatpush3.bf16.msra.mxu1 %v1215_v48  ;;  %v451_v48 = vld [vmem:[#allocation11 + $0x48] sm:$0xff] }
 0x170   :  { %1220 = vmatprep.subr.bf16.mxu1 %v1219_v51  ;;  %v1279_v49 = vpack.c.bf16 %v451_v48, %v450_v47 }
 0x173   :  { %1222 = vmatpush3.bf16.msra.mxu1 %v1219_v51  ;;  %v453_v51 = vld [vmem:[#allocation11 + $0x58] sm:$0xff] }
 0x174   :  { %1224 = vmatprep.subr.bf16.mxu1 %v1223_v54  ;;  %v1283_v52 = vpack.c.bf16 %v453_v51, %v452_v50 }
 0x177   :  { %1226 = vmatpush3.bf16.msra.mxu1 %v1223_v54  ;;  %v455_v54 = vld [vmem:[#allocation11 + $0x68] sm:$0xff] }
 0x17a   :  { %1045 = vmatmul.mubr.f32.vlgmr.msra.gmra.mrb[0].mxu1 %v1779_v1 }
 0x24d   :  { %v1046_v56 = vpop.f32.mrb[0].mxu1 }
 0x24e   :  { %v400_v57 = vpop.f32.mrb[1].mxu1  ;;  %v1327_v59 = vadd.f32 %v1046_v56, %v867_v55  ;;  %v456_v56 = vld [vmem:[#allocation11 + $0x70] sm:$0xff] }
 0x24f   :  { %v1328_v58 = vadd.f32 %v867_v55, %v400_v57  ;;  %v1287_v55 = vpack.c.bf16 %v455_v54, %v454_v53  ;;  %v457_v57 = vld [vmem:[#allocation11 + $0x78] sm:$0xff] }
 0x250   :  { %v412_v61 = vmul.f32 %v1327_v59, %v1327_v59 }
 0x251   :  { %v411_v60 = vmul.f32 %v1328_v58, %v1328_v58 }
 0x253   :  { %413 = vadd.xlane.f32.xlu0 %v411_v60  ;;  %v706_v60 = vld [vmem:[#allocation13 + $0x8] sm:$0xff] }
 0x257   :  { %415 = vadd.xlane.f32.xlu0 %v412_v61 }
 0x2e0   :  { %v414_v62 = vpop.xlane.xlu0 %413 }
 0x2e1   :  { %v417_v63 = vmax.f32 %v414_v62, 1e-24  ;;  %v870_v62 = vld [vmem:[%s1842_s6] ss:$0 sm:$0xff] }
 0x2e3   :  { %1346 = vrsqrt.f32 %v417_v63 }
 0x2e4   :  { %v416_v0 = vpop.xlane.xlu0 %415 }
 0x2e5   :  { %v418_v2 = vmax.f32 %v416_v0, 1e-24 }
 0x2e7   :  { %1348 = vrsqrt.f32 %v418_v2 }
 0x2ed   :  { %v1347_v3 = vpop.eup %1346 }
 0x2ee   :  { %v421_v1 = vmul.f32 %v1347_v3, %v1328_v58  ;;  %v1291_v58 = vpack.c.bf16 %v457_v57, %v456_v56 }
 0x2f0   :  { %1350 = vtanh.f32 %v421_v1 }
 0x2f1   :  { %v1349_v4 = vpop.eup %1348 }
 0x2f2   :  { %v422_v5 = vmul.f32 %v1349_v4, %v1327_v59  ;;  %v705_v59 = vld [vmem:[#allocation13] sm:$0xff] }
 0x2f3   :  { %v1295_v61 = vpack.c.bf16 %v706_v60, %v705_v59 }
 0x2f4   :  { %1352 = vtanh.f32 %v422_v5  ;;  %v707_v5 = vld [vmem:[#allocation13 + $0x10] sm:$0xff] }
 0x2f5   :  { %1296 = vmatprep.subr.bf16.mxu1 %v1295_v61  ;;  %v1299_v7 = vpack.c.bf16 %v708_v6, %v707_v5 }
 0x2f6   :  { %1298 = vmatpush3.bf16.msra.mxu1 %v1295_v61 }
 0x2f7   :  { %1300 = vmatprep.subr.bf16.mxu1 %v1299_v7 }
 0x2fa   :  { %v1351_v8 = vpop.eup %1350  ;;  %1302 = vmatpush3.bf16.msra.mxu1 %v1299_v7 }
 0x2fe   :  { %v1794_v9 = vpop.eup %1352 }
 0x2ff   :  { %v1227_v10 = vpack.c.bf16 %v1794_v9, %v1351_v8 }
 0x301   :  { %1228 = vmatprep.subr.bf16.mxu0 %v1227_v10 }
 0x302   :  { %1230 = vmatpush3.bf16.msra.mxu0 %v1227_v10 }
 0x303   :  { %1232 = vmatprep.subr.bf16.mxu0 %v1231_v11 }
 0x305   :  { %1052 = vmatmul.mubr.msk.f32.vlgmr.msra.gmra.mrb[2].mxu0 %vm171_vm0, %v1784_v12  ;;  %v438_v12 = vld [vmem:[#allocation10 + $0x68] sm:$0xff] }
 0x306   :  { %1234 = vmatpush3.bf16.msra.mxu0 %v1231_v11  ;;  %v1255_v29 = vpack.c.bf16 %v438_v12, %v437_v28  ;;  %v711_v11 = vld [vmem:[#allocation13 + $0x30] sm:$0xff] }
 0x307   :  { %1236 = vmatprep.subr.bf16.mxu0 %v1235_v15  ;;  %v1307_v14 = vpack.c.bf16 %v712_v13, %v711_v11 }
 0x30a   :  { %1238 = vmatpush3.bf16.msra.mxu0 %v1235_v15  ;;  %v713_v15 = vld [vmem:[#allocation13 + $0x40] sm:$0xff] }
 0x30b   :  { %1240 = vmatprep.subr.bf16.mxu0 %v1239_v18  ;;  %v1311_v17 = vpack.c.bf16 %v714_v16, %v713_v15 }
 0x30e   :  { %1242 = vmatpush3.bf16.msra.mxu0 %v1239_v18  ;;  %v715_v18 = vld [vmem:[#allocation13 + $0x50] sm:$0xff] }
 0x30f   :  { %1244 = vmatprep.subr.bf16.mxu0 %v1243_v21  ;;  %v1315_v20 = vpack.c.bf16 %v716_v19, %v715_v18 }
 0x312   :  { %1246 = vmatpush3.bf16.msra.mxu0 %v1243_v21  ;;  %v717_v21 = vld [vmem:[#allocation13 + $0x60] sm:$0xff] }
 0x313   :  { %1248 = vmatprep.subr.bf16.mxu0 %v1247_v24  ;;  %v1319_v23 = vpack.c.bf16 %v718_v22, %v717_v21 }
 0x316   :  { %1250 = vmatpush3.bf16.msra.mxu0 %v1247_v24  ;;  %v719_v24 = vld [vmem:[#allocation13 + $0x70] sm:$0xff] }
 0x317   :  { %1252 = vmatprep.subr.bf16.mxu0 %v1251_v27  ;;  %v1323_v26 = vpack.c.bf16 %v720_v25, %v719_v24 }
 0x31a   :  { %1254 = vmatpush3.bf16.msra.mxu0 %v1251_v27 }
 0x31b   :  { %1256 = vmatprep.subr.bf16.mxu0 %v1255_v29 }
 0x31e   :  { %1258 = vmatpush3.bf16.msra.mxu0 %v1255_v29 }
 0x31f   :  { %1260 = vmatprep.subr.bf16.mxu0 %v1259_v32 }
 0x322   :  { %1262 = vmatpush3.bf16.msra.mxu0 %v1259_v32 }
 0x323   :  { %1264 = vmatprep.subr.bf16.mxu0 %v1263_v35 }
 0x3d8   :  { %v1053_v38 = vpop.f32.mrb[2].mxu0 }
 0x3d9   :  { %v524_v39 = vpop.f32.mrb[3].mxu0 }
 0x3da   :  { %1086 = vmatprep.mubr.f32.mxu0 %v524_v39 }
 0x3db   :  { %1087 = vmatmul.mubr.f32.vlgmr.msra.gmra.mrb[4].mxu0 %v1053_v38 }
 0x3dc   :  { %1266 = vmatpush3.bf16.msra.mxu0 %v1263_v35  ;;  %1121 = vmatprep.mubr.f32.mxu0 %v1351_v8  ;;  %v709_v8 = vld [vmem:[#allocation13 + $0x20] sm:$0xff] }
 0x3dd   :  { %1268 = vmatprep.subr.bf16.mxu0 %v1267_v40 }
 0x3e0   :  { %1270 = vmatpush3.bf16.msra.mxu0 %v1267_v40 }
 0x3e1   :  { %1272 = vmatprep.subr.bf16.mxu0 %v1271_v43 }
 0x3e4   :  { %1274 = vmatpush3.bf16.msra.mxu0 %v1271_v43 }
 0x3e5   :  { %1276 = vmatprep.subr.bf16.mxu0 %v1275_v46 }
 0x3e8   :  { %1278 = vmatpush3.bf16.msra.mxu0 %v1275_v46 }
 0x3e9   :  { %1280 = vmatprep.subr.bf16.mxu0 %v1279_v49 }
 0x3ec   :  { %1282 = vmatpush3.bf16.msra.mxu0 %v1279_v49 }
 0x3ed   :  { %1284 = vmatprep.subr.bf16.mxu0 %v1283_v52 }
 0x3f0   :  { %1286 = vmatpush3.bf16.msra.mxu0 %v1283_v52 }
 0x3f1   :  { %1288 = vmatprep.subr.bf16.mxu0 %v1287_v55 }
 0x3f4   :  { %1290 = vmatpush3.bf16.msra.mxu0 %v1287_v55 }
 0x3f5   :  { %1292 = vmatprep.subr.bf16.mxu0 %v1291_v58 }
 0x3f8   :  { %1294 = vmatpush3.bf16.msra.mxu0 %v1291_v58 }
 0x3fb   :  { %1122 = vmatmul.mubr.f32.vlgmr.msra.gmra.mrb[4].mxu0 %v1794_v9  ;;  %v710_v9 = vld [vmem:[#allocation13 + $0x28] sm:$0xff] }
 0x3fc   :  { %v1303_v10 = vpack.c.bf16 %v710_v9, %v709_v8 }
 0x3fe   :  { %1304 = vmatprep.subr.bf16.mxu1 %v1303_v10 }
 0x3ff   :  { %1306 = vmatpush3.bf16.msra.mxu1 %v1303_v10 }
 0x400   :  { %1308 = vmatprep.subr.bf16.mxu1 %v1307_v14 }
 0x403   :  { %1310 = vmatpush3.bf16.msra.mxu1 %v1307_v14 }
 0x404   :  { %1312 = vmatprep.subr.bf16.mxu1 %v1311_v17 }
 0x407   :  { %1314 = vmatpush3.bf16.msra.mxu1 %v1311_v17 }
 0x408   :  { %1316 = vmatprep.subr.bf16.mxu1 %v1315_v20 }
 0x40b   :  { %1318 = vmatpush3.bf16.msra.mxu1 %v1315_v20 }
 0x40c   :  { %1320 = vmatprep.subr.bf16.mxu1 %v1319_v23 }
 0x40f   :  { %1322 = vmatpush3.bf16.msra.mxu1 %v1319_v23 }
 0x410   :  { %1324 = vmatprep.subr.bf16.mxu1 %v1323_v26 }
 0x413   :  { %1326 = vmatpush3.bf16.msra.mxu1 %v1323_v26 }
 0x4ce   :  { %v1123_v63 = vpop.f32.mrb[4].mxu0 }
 0x4cf   :  { %v680_v0 = vpop.f32.mrb[5].mxu0  ;;  %v1329_v3 = vadd.f32 %v1123_v63, %v870_v62 }
 0x4d0   :  { %v1330_v2 = vadd.f32 %v870_v62, %v680_v0 }
 0x4d1   :  { %v692_v4 = vmul.f32 %v1329_v3, %v1329_v3 }
 0x4d2   :  { %v691_v1 = vmul.f32 %v1330_v2, %v1330_v2 }
 0x4d4   :  { %693 = vadd.xlane.f32.xlu1 %v691_v1 }
 0x4d8   :  { %695 = vadd.xlane.f32.xlu1 %v692_v4 }
 0x561   :  { %v694_v27 = vpop.xlane.xlu1 %693 }
 0x562   :  { %v697_v28 = vmax.f32 %v694_v27, 1e-24 }
 0x564   :  { %1354 = vrsqrt.f32 %v697_v28 }
 0x565   :  { %v696_v12 = vpop.xlane.xlu1 %695 }
 0x566   :  { %v698_v29 = vmax.f32 %v696_v12, 1e-24 }
 0x568   :  { %1356 = vrsqrt.f32 %v698_v29 }
 0x56e   :  { %v1355_v30 = vpop.eup %1354 }
 0x56f   :  { %v701_v31 = vmul.f32 %v1355_v30, %v1330_v2 }
 0x571   :  { %1358 = vtanh.f32 %v701_v31 }
 0x572   :  { %v1357_v32 = vpop.eup %1356 }
 0x573   :  { %v702_v33 = vmul.f32 %v1357_v32, %v1329_v3 }
 0x575   :  { %1360 = vtanh.f32 %v702_v33 }
 0x57b   :  { %v1359_v34 = vpop.eup %1358 }
 0x57c   :  { %827 = vst [vmem:[#allocation15] sm:$0xff] %v1359_v34  ;;  %1156 = vmatprep.mubr.f32.mxu1 %v1359_v34 }
 0x57f   :  { %v1361_v35 = vpop.eup %1360 }
 0x580   :  { %828 = vst [vmem:[#allocation15 + $0x8] sm:$0xff] %v1361_v35  ;;  %1157 = vmatmul.mubr.f32.vlgmr.msra.gmra.mrb[2].mxu1 %v1361_v35 }
 0x653   :  { %v1158_v37 = vpop.f32.mrb[2].mxu1 }
 0x654   :  { %v800_v38 = vadd.f32 %v1158_v37, %v871_v36  ;;  %v794_v39 = vpop.f32.mrb[3].mxu1 }
 0x655   :  { %v795_v40 = vadd.f32 %v871_v36, %v794_v39 }
 0x656   :  { %805 = vmax.xlane.f32.xlu1 %v800_v38 }
 0x657   :  { %803 = vmax.xlane.f32.xlu0 %v795_v40 }
 0x6e3   :  { %v806_v41 = vpop.xlane.xlu1 %805 }
 0x6e4   :  { %v808_v42 = vsub.f32 %v800_v38, %v806_v41  ;;  %v804_v43 = vpop.xlane.xlu0 %803 }
 0x6e5   :  { %v807_v44 = vsub.f32 %v795_v40, %v804_v43 }
 0x6e6   :  { %v811_v45 = vmul.f32 1.442695, %v808_v42 }
 0x6e7   :  { %v809_v46 = vmul.f32 1.442695, %v807_v44 }
 0x6e8   :  { %1362 = vpow2.f32 %v811_v45 }
 0x6e9   :  { %1364 = vpow2.f32 %v809_v46 }
 0x6f2   :  { %v1363_v47 = vpop.eup %1362 }
 0x6f3   :  { %v1365_v48 = vpop.eup %1364  ;;  %815 = vadd.xlane.f32.xlu1 %v1363_v47 }
 0x6f4   :  { %813 = vadd.xlane.f32.xlu0 %v1365_v48 }
 0x6f5   :  { %1535 = shalt.err (!%p1532_p4)
}
 0x6f6   :  { %s1536_s25 = scalar_lea.hbm %s1847_s11, 256 }
 0x6f7   :  { %p1537_p5 = scmp.ne.s32.totalorder %s1847_s11, %s1536_s25  ;;  %p1540_p6 = scmp.lt.u32.totalorder %s1536_s25, %s1847_s11 }
 0x6f9   :  { %p1542_p7 = pnand %p1540_p6, %p1537_p5 }
 0x6fb   :  { %1545 = shalt.err (!%p1542_p7)
}
 0x6fc   :  { %852 = dma.vmem_to_hbm [thread:$0]  %s847_s9, 256, %s1847_s11, [#allocation16], %s1582_s29, %s1582_s29, %s1583_s30  }
 0x6fd   :  { %s1590_s4 = smov [#allocation14]  }
 0x6fe   :  { %s834_s20 = sshll.u32 %s1590_s4, 4  ;;  %s835_s20 = int_to_ptr.vmem [resolvable:$true] %s834_s20 }
 0x6ff   :  { %s1546_s19 = scalar_lea.vmem %s835_s20, 256  ;;  %p1551_p9 = scmp.lt.s32.totalorder %s835_s20, %s835_s20 }
 0x700   :  { %p1547_p8 = scmp.ne.s32.totalorder %s835_s20, %s1546_s19  ;;  %p1552_p10 = scmp.lt.s32.totalorder %s1546_s19, %s1546_s19 }
 0x702   :  { %p1553_p11 = por %p1552_p10, %p1551_p9 }
 0x704   :  { %p1554_p12 = pnand %p1553_p11, %p1547_p8 }
 0x780   :  { %v816_v49 = vpop.xlane.xlu1 %815 }
 0x781   :  { %1366 = vlog2.f32 %v816_v49  ;;  %v814_v50 = vpop.xlane.xlu0 %813 }
 0x782   :  { %1368 = vlog2.f32 %v814_v50 }
 0x78b   :  { %v1367_v51 = vpop.eup %1366 }
 0x78c   :  { %v1369_v52 = vpop.eup %1368  ;;  %v820_v53 = vmul.f32 0.6931472, %v1367_v51 }
 0x78d   :  { %v818_v54 = vmul.f32 0.6931472, %v1369_v52 }
 0x78e   :  { %v822_v55 = vadd.f32 %v820_v53, %v806_v41 }
 0x78f   :  { %v821_v56 = vadd.f32 %v818_v54, %v804_v43 }
 0x790   :  { %v824_v57 = vsub.f32 %v800_v38, %v822_v55 }
 0x791   :  { %v823_v58 = vsub.f32 %v795_v40, %v821_v56 }
 0x792   :  { %826 = vst [vmem:[#allocation14 + $0x8] sm:$0xff] %v824_v57 }
 0x793   :  { %825 = vst [vmem:[#allocation14] sm:$0xff] %v823_v58 }
 0x794   :  { %1557 = shalt.err (!%p1554_p12)
}
 0x795   :  { %s1558_s22 = scalar_lea.hbm %s1846_s10, 256 }
 0x796   :  { %p1559_p13 = scmp.ne.s32.totalorder %s1846_s10, %s1558_s22  ;;  %p1562_p0 = scmp.lt.u32.totalorder %s1558_s22, %s1846_s10 }
 0x798   :  { %p1564_p1 = pnand %p1562_p0, %p1559_p13 }
 0x79a   :  { %1567 = shalt.err (!%p1564_p1)
}
 0x79b   :  { %840 = dma.vmem_to_hbm [thread:$0]  %s835_s20, 256, %s1846_s10, [#allocation4], %s1582_s29, %s1582_s29, %s1583_s30  }
 0x79c   :  { %1576 = dma.done.wait [#allocation4], 256  }
 0x79d   :  { %1577 = vsyncadd [#allocation4], 4294967040 }
 0x79e   :  { %1578 = dma.done.wait [#allocation16], 256  }
 0x79f   :  { %1579 = vsyncadd [#allocation16], 4294967040 }
 0x7a0   :  { %859 = vsyncpa [#allocation3], 1 }
 0x7a1   :  { %860 = vsyncpa [#allocation6], 1 }
 0x7a2   :  { %861 = vsyncpa [#allocation9], 1 }
 0x7a3   :  { %862 = vsyncpa [#allocation12], 1 }
 0x7a4   :  { %863 = vsyncpa [#allocation4], 1 }
 0x7a5   :  { %864 = vsyncpa [#allocation16], 1 }

</bundles_post_ra>
